<compile_context>
chip_gen: v7x
topology: tpu7x:2x2x1
jax: 0.10.0
libtpu: 0.0.40
codegen_flags: <defaults>
</compile_context>

<pallas_src>
import numpy as np

import jax
import jax.numpy as jnp
from jax.experimental import pallas as pl
from jax.experimental.pallas import tpu as pltpu


# ---------------------------------------------------------------------------
# Glue: te_gain_neighbor_band as a single constant-index gather of the tiny
# per-batch "center pixel" vector (band elements per batch).
# ---------------------------------------------------------------------------
def _te_gain_gather_index(band, neighbor_band):
    """Constant (band, nb) index map + validity mask replicating the torch
    center-roll + reshape((B,nb,band)->(B,band,nb)) construction."""
    nn_ = neighbor_band // 2
    shifts = np.zeros((neighbor_band,), dtype=np.int64)
    valid = np.zeros((neighbor_band,), dtype=np.float32)
    valid[nn_ - 1] = 1.0
    valid[nn_] = 1.0
    for i in range(nn_ - 1):
        shifts[i] = nn_ - i             # roll right by nn_-i
        valid[i] = 1.0
        shifts[nn_ + 1 + i] = -(i + 1)  # roll left by i+1
        valid[nn_ + 1 + i] = 1.0
    flat = np.arange(band * neighbor_band)
    row = flat // band
    col = flat % band
    idx = (col - shifts[row]) % band
    mask = valid[row]
    return (idx.reshape(band, neighbor_band).astype(np.int32),
            mask.reshape(band, neighbor_band).astype(np.float32))


def te_gain_neighbor_band_jax(x_raw, *, band, neighbor_band, patch):
    """Exact torch semantics: the (B,band,H,W)->(B,H,W,band) step is a
    *reshape* (not a permute), so the 'center pixel' is a contiguous
    band-sized slice of the flat per-batch data.
    # TODO(synk): verify the reshape-not-permute layout assumption once
    # against the actual PyTorch MRTokenG (the in-script reference is built
    # on the same assumption, so it cannot catch a mismatch)."""
    B = x_raw.shape[0]
    W = x_raw.shape[3]
    z = patch // 2 + 1
    off = (z - 1) * W * band + (z - 1) * band
    center = x_raw.reshape(B, -1)[:, off:off + band].astype(jnp.float32)  # (B, band)
    idx, mask = _te_gain_gather_index(band, neighbor_band)
    x_spe = center[:, idx.reshape(-1)].reshape(B, band, neighbor_band)
    return x_spe * jnp.asarray(mask)[None, :, :]


# ---------------------------------------------------------------------------
# Pallas kernel: Linear(pp -> dim) + Mish on the depthwise-conv result,
# row-blocked over R = B * num_patches.
# ---------------------------------------------------------------------------
def _mrtoken_kernel(x_fe_ref, w_ref, b_ref, x_dw_ref, out_ref):
    # x_fe_ref : (TM, patch*patch) f32   -- dominant stream, read once
    # w_ref    : (patch*patch, dim) f32  (constant index_map -> resident)
    # b_ref    : (1, dim)           f32  (constant index_map -> resident)
    # x_dw_ref : (TM, nb)           f32  -- depthwise 1x1 conv output, pre-Mish
    # out_ref  : (TM, dim + nb)     bf16

    # Linear(patch*patch -> dim): f32 MXU matmul (FLOPs negligible here).
    y_fc = jnp.dot(x_fe_ref[...], w_ref[...],
                   preferred_element_type=jnp.float32) + b_ref[...]

    # Mish(y) = y * tanh(softplus(y)) = y * (s - 1) / (s + 1),  s = (1+e^y)^2.
    # One EUP exp + one EUP approx reciprocal.  The clamp keeps s finite both
    # for large y (tanh(softplus(y)) == 1 to f32 precision for y >= 20) and
    # for the UNINITIALIZED rows of a ragged last block (those rows are
    # masked on writeback, but must not produce inf/nan traps) -- keep it.
    y = x_dw_ref[...]
    e = jnp.exp(jnp.minimum(y, 20.0))
    s = (1.0 + e) * (1.0 + e)
    y_mish = y * (s - 1.0) * pl.reciprocal(s + 1.0, approx=True)

    # Both halves land in the same (8,128) lane tile: assemble once on the
    # (otherwise idle) XLU and issue a single store instead of two vst.msk.
    out_ref[...] = jnp.concatenate([y_fc, y_mish], axis=-1).astype(out_ref.dtype)


def mrtoken_forward(x_raw, x_fe, params, *, dim, patch, band, neighbor_band,
                    num_patches):
    del band  # interface parity with the torch module; band == num_patches
    B = x_raw.shape[0]
    P = num_patches
    nb = neighbor_band
    pp = patch * patch
    w_fc, b_fc, dw_w, dw_b = params

    # ---- glue: te_gain gather + depthwise 1x1 conv (scale+bias per patch).
    # Both operate on a tiny (B, P, nb) tensor, so they stay wrapper-side;
    # shipping per-row (R,1) scale/bias streams to the kernel costs far more
    # HBM/VMEM than it saves.
    x_spe = te_gain_neighbor_band_jax(
        x_raw, band=P, neighbor_band=nb, patch=patch)              # (B, P, nb) f32
    x_dw = x_spe * dw_w.reshape(1, P, 1) + dw_b.reshape(1, P, 1)   # depthwise conv

    R = B * P
    x_fe_2d = x_fe.reshape(R, pp)          # free reshape, NO dtype pass
    x_dw_2d = x_dw.reshape(R, nb)
    w_f32 = w_fc.astype(jnp.float32)
    b_f32 = b_fc.astype(jnp.float32).reshape(1, dim)

    # ---- row tiling ----
    if R <= 4096:
        TM = R                               # single grid step
    else:
        # >= 2 steps so the "parallel" axis can shard across v7x's 2 TCs;
        # sublane-aligned; lane-padded double-buffered footprint at TM=4096
        # is ~10 MiB, inside the 32 MiB limit set below on all generations.
        TM = min(4096, ((pl.cdiv(R, 2) + 7) // 8) * 8)
    grid = (pl.cdiv(R, TM),)

    out2d = pl.pallas_call(
        _mrtoken_kernel,
        out_shape=jax.ShapeDtypeStruct((R, dim + nb), jnp.bfloat16),
        grid_spec=pltpu.PrefetchScalarGridSpec(
            num_scalar_prefetch=0,
            grid=grid,
            in_specs=[
                pl.BlockSpec((TM, pp), lambda i: (i, 0)),
                pl.BlockSpec((pp, dim), lambda i: (0, 0)),   # resident weight
                pl.BlockSpec((1, dim), lambda i: (0, 0)),    # resident bias
                pl.BlockSpec((TM, nb), lambda i: (i, 0)),
            ],
            out_specs=pl.BlockSpec((TM, dim + nb), lambda i: (i, 0)),
        ),
        compiler_params=pltpu.CompilerParams(
            dimension_semantics=("parallel",),
            vmem_limit_bytes=32 * 1024 * 1024),
    )(x_fe_2d, w_f32, b_f32, x_dw_2d)

    # Output stays bf16 (halves the largest HBM stream); up-cast only if a
    # downstream consumer truly needs f32.
    return out2d.reshape(B, P, dim + nb)


# ---------------------------------------------------------------------------
# Deterministic parameter init (nn.Linear(patch*patch, dim) + depthwise conv).
# NOTE: self.pooling and self.spe_para are defined in __init__ but unused in
# the reference forward(), so they are not materialized here.
# ---------------------------------------------------------------------------
def init_params(key, *, dim, patch, num_patches):
    pp = patch * patch
    k1, k2, k3, k4 = jax.random.split(key, 4)
    w_fc = jax.random.normal(k1, (pp, dim), dtype=jnp.float32) * 0.05
    b_fc = jax.random.normal(k2, (1, dim), dtype=jnp.float32) * 0.05
    # Conv2d(num_patches, num_patches, k=(1,1), groups=num_patches):
    # weight (num_patches,1,1,1) -> per-channel scale; bias (num_patches,).
    dw_w = jax.random.normal(k3, (num_patches, 1), dtype=jnp.float32) * 0.5 + 1.0
    dw_b = jax.random.normal(k4, (num_patches, 1), dtype=jnp.float32) * 0.1
    return w_fc, b_fc, dw_w, dw_b


# ---------------------------------------------------------------------------
# Pure-JAX reference (f32 matmul, exact softplus/tanh, loop/roll te_gain) --
# intentionally a different construction than the kernel path.
# ---------------------------------------------------------------------------
def _te_gain_reference(x_raw, *, band, neighbor_band, patch):
    B = x_raw.shape[0]
    H, W = x_raw.shape[2], x_raw.shape[3]
    x_train = x_raw.reshape(B, H, W, band)          # reshape, NOT a permute
    nn_ = neighbor_band // 2
    z = patch // 2 + 1
    center = x_train[:, z - 1, z - 1, :]
    rows = jnp.zeros((B, neighbor_band, band), dtype=jnp.float32)
    rows = rows.at[:, nn_ - 1, :].set(center)
    rows = rows.at[:, nn_, :].set(center)
    for i in range(nn_ - 1):
        rows = rows.at[:, i, :].set(jnp.roll(center, nn_ - i, axis=1))
        rows = rows.at[:, nn_ + 1 + i, :].set(jnp.roll(center, -(i + 1), axis=1))
    return rows.reshape(B, band, neighbor_band).astype(jnp.float32)


if __name__ == "__main__":
    B = 2
    patch = 5
    num_patches = 8          # == "band" passed to te_gain_neighbor_band
    neighbor_band = 4
    dim = 16

    key = jax.random.PRNGKey(0)
    kx, kf, kp = jax.random.split(key, 3)
    x_raw = jax.random.normal(kx, (B, num_patches, patch, patch), dtype=jnp.float32)
    x_fe = jax.random.normal(kf, (B, num_patches, patch, patch), dtype=jnp.float32)
    params = init_params(kp, dim=dim, patch=patch, num_patches=num_patches)

    out = mrtoken_forward(
        x_raw, x_fe, params,
        dim=dim, patch=patch, band=num_patches,
        neighbor_band=neighbor_band, num_patches=num_patches,
    )
    out = jax.block_until_ready(out)

    # Reference (f32 everywhere, exact Mish).
    w_fc, b_fc, dw_w, dw_b = params
    x_spe_ref = _te_gain_reference(
        x_raw, band=num_patches, neighbor_band=neighbor_band, patch=patch)
    y_fc_ref = x_fe.reshape(B, num_patches, patch * patch) @ w_fc + b_fc
    y_dw = x_spe_ref * dw_w[None, :, :] + dw_b[None, :, :]
    y_mish = y_dw * jnp.tanh(jax.nn.softplus(y_dw))
    ref = jnp.concatenate([y_fc_ref, y_mish], axis=-1)

    assert out.shape == (B, num_patches, dim + neighbor_band)
    out_f32 = out.astype(jnp.float32)
    # bf16 output store + EUP approx reciprocal -> loosened tolerance.
    err = float(jnp.max(jnp.abs(out_f32 - ref)))
    assert jnp.allclose(out_f32, ref, atol=2e-2, rtol=2e-2), err
    print("KERNEL_OK")
</pallas_src>

<mosaic_0001>
module attributes {stable_mosaic.version = 11 : i64} {
  func.func @_mrtoken_kernel(%arg0: i32, %arg1: memref<16x25xf32, #tpu.memory_space<vmem>>, %arg2: memref<25x16xf32, #tpu.memory_space<vmem>>, %arg3: memref<1x16xf32, #tpu.memory_space<vmem>>, %arg4: memref<16x4xf32, #tpu.memory_space<vmem>>, %arg5: memref<16x20xbf16, #tpu.memory_space<vmem>>) attributes {dimension_semantics = [#tpu.dimension_semantics<parallel>], iteration_bounds = array<i64: 1>, scalar_prefetch = 0 : i64, scratch_operands = 0 : i64, tpu.core_type = #tpu.core_type<tc>, window_params = [{transform_indices = @transform_0, window_bounds = array<i64: 16, 25>}, {pipeline_mode = #tpu.pipeline_mode<synchronous>, transform_indices = @transform_1, window_bounds = array<i64: 25, 16>}, {pipeline_mode = #tpu.pipeline_mode<synchronous>, transform_indices = @transform_2, window_bounds = array<i64: 1, 16>}, {transform_indices = @transform_3, window_bounds = array<i64: 16, 4>}, {transform_indices = @transform_4, window_bounds = array<i64: 16, 20>}]} {
    %c0 = arith.constant 0 : index
    %c0_0 = arith.constant 0 : index
    %0 = vector.load %arg1[%c0, %c0_0] : memref<16x25xf32, #tpu.memory_space<vmem>>, vector<16x25xf32>
    %c0_1 = arith.constant 0 : index
    %c0_2 = arith.constant 0 : index
    %1 = vector.load %arg2[%c0_1, %c0_2] : memref<25x16xf32, #tpu.memory_space<vmem>>, vector<25x16xf32>
    %cst = arith.constant dense<0.000000e+00> : vector<16x16xf32>
    %2 = tpu.matmul %0, %1, %cst {dimension_numbers = #tpu.dot_dimension_numbers<[1], [0], [0], [1], [0, 0, 1, 1], [], []>} : vector<16x25xf32>, vector<25x16xf32>, vector<16x16xf32> -> vector<16x16xf32>
    %c0_3 = arith.constant 0 : index
    %c0_4 = arith.constant 0 : index
    %3 = vector.load %arg3[%c0_3, %c0_4] : memref<1x16xf32, #tpu.memory_space<vmem>>, vector<1x16xf32>
    %4 = vector.broadcast %3 : vector<1x16xf32> to vector<16x16xf32>
    %5 = arith.addf %2, %4 : vector<16x16xf32>
    %c0_5 = arith.constant 0 : index
    %c0_6 = arith.constant 0 : index
    %6 = vector.load %arg4[%c0_5, %c0_6] : memref<16x4xf32, #tpu.memory_space<vmem>>, vector<16x4xf32>
    %cst_7 = arith.constant 2.000000e+01 : f32
    %7 = vector.broadcast %cst_7 : f32 to vector<16x4xf32>
    %8 = arith.minimumf %6, %7 : vector<16x4xf32>
    %9 = math.exp %8 : vector<16x4xf32>
    %cst_8 = arith.constant 1.000000e+00 : f32
    %10 = vector.broadcast %cst_8 : f32 to vector<16x4xf32>
    %11 = arith.addf %10, %9 : vector<16x4xf32>
    %cst_9 = arith.constant 1.000000e+00 : f32
    %12 = vector.broadcast %cst_9 : f32 to vector<16x4xf32>
    %13 = arith.addf %12, %9 : vector<16x4xf32>
    %14 = arith.mulf %11, %13 : vector<16x4xf32>
    %cst_10 = arith.constant 1.000000e+00 : f32
    %15 = vector.broadcast %cst_10 : f32 to vector<16x4xf32>
    %16 = arith.subf %14, %15 : vector<16x4xf32>
    %17 = arith.mulf %6, %16 : vector<16x4xf32>
    %cst_11 = arith.constant 1.000000e+00 : f32
    %18 = vector.broadcast %cst_11 : f32 to vector<16x4xf32>
    %19 = arith.addf %14, %18 : vector<16x4xf32>
    %20 = tpu.reciprocal %19 {approx = true} : vector<16x4xf32> -> vector<16x4xf32>
    %21 = arith.mulf %17, %20 : vector<16x4xf32>
    %22 = tpu.concatenate %5, %21 in 1 : vector<16x16xf32>, vector<16x4xf32> -> vector<16x20xf32>
    %23 = arith.truncf %22 : vector<16x20xf32> to vector<16x20xbf16>
    %c0_12 = arith.constant 0 : index
    %c0_13 = arith.constant 0 : index
    %24 = vector.load %arg5[%c0_12, %c0_13] : memref<16x20xbf16, #tpu.memory_space<vmem>>, vector<16x20xbf16>
    tpu.vector_store %arg5[%c0_12, %c0_13], %23 {strides = array<i32>} : memref<16x20xbf16, #tpu.memory_space<vmem>>, vector<16x20xbf16>,
    return
  }
  func.func @transform_0(%arg0: i32) -> (i32, i32) {
    %c0_i32 = arith.constant 0 : i32
    %c0_i32_0 = arith.constant 0 : i32
    return %arg0, %c0_i32 : i32, i32
  }
  func.func @transform_1(%arg0: i32) -> (i32, i32) {
    %c0_i32 = arith.constant 0 : i32
    %c0_i32_0 = arith.constant 0 : i32
    %c0_i32_1 = arith.constant 0 : i32
    return %c0_i32, %c0_i32_0 : i32, i32
  }
  func.func @transform_2(%arg0: i32) -> (i32, i32) {
    %c0_i32 = arith.constant 0 : i32
    %c0_i32_0 = arith.constant 0 : i32
    %c0_i32_1 = arith.constant 0 : i32
    return %c0_i32, %c0_i32_0 : i32, i32
  }
  func.func @transform_3(%arg0: i32) -> (i32, i32) {
    %c0_i32 = arith.constant 0 : i32
    %c0_i32_0 = arith.constant 0 : i32
    return %arg0, %c0_i32 : i32, i32
  }
  func.func @transform_4(%arg0: i32) -> (i32, i32) {
    %c0_i32 = arith.constant 0 : i32
    %c0_i32_0 = arith.constant 0 : i32
    return %arg0, %c0_i32 : i32, i32
  }
}

</mosaic_0001>

<bundles_post_ra>
// kernel: tpu_custom_call.1
= control target key start
LH: loop header
LB: loop body
LE: loop exit
PB: predicated region body
PF: predicated region fallthrough
CT: control target
= control target key end

     0   :  { %vm38_vm0 = vcmask 1040384   ;;  %vm31_vm1 = vcmask 203776   ;;  %vm256_vm2 = vmmov 1   ;;  %s327_s0 = inlined_call_operand.vmem [shape: f32[16,25], index: 0, kind: input, shape index: {}]   ;;  %s328_s1 = inlined_call_operand.vmem [shape: f32[25,16], index: 1, kind: input, shape index: {}]   ;;  %s329_s2 = inlined_call_operand.vmem [shape: f32[1,16], index: 2, kind: input, shape index: {}]   ;;  %s330_s3 = inlined_call_operand.vmem [shape: f32[16,4], index: 3, kind: input, shape index: {}]   ;;  %s331_s4 = inlined_call_operand.hbm [shape: bf16[16,20], index: 4, kind: output, shape index: {}]  }
   0x1   :  { %v20_v0 = vld [vmem:[%s328_s1] sm:$0xff]  ;;  %v21_v1 = vld [vmem:[%s328_s1 + $0x8] sm:$0xff]  ;;  %v22_v2 = vld [vmem:[%s328_s1 + $0x10] sm:$0xff] }
   0x2   :  { %v204_v3 = vpack.c.bf16 %v21_v1, %v20_v0  ;;  %v23_v4 = vld [vmem:[%s328_s1 + $0x18] sm:$0x1]  ;;  %v18_v5 = vld [vmem:[%s327_s0] sm:$0xff]  ;;  %vm209_vm3 = vmpackc.low %vm38_vm0, %vm256_vm2 }
   0x3   :  { %v208_v6 = vpack.c.bf16 %v23_v4, %v22_v2  ;;  %201 = vmatprep.mubr.msk.f32.mxu0 %vm31_vm1, %v18_v5  ;;  %v117_v7 = vld [vmem:[%s330_s3] sm:$0xff]  ;;  %v118_v8 = vld [vmem:[%s330_s3 + $0x8] sm:$0xff] }
   0x4   :  { %205 = vmatprep.subr.bf16.mxu0 %v204_v3  ;;  %v119_v9 = vmin.f32 %v117_v7, 20.0  ;;  %v120_v10 = vmin.f32 %v118_v8, 20.0 }
   0x5   :  { %9 = vsyncpa [#allocation3], 0  ;;  %207 = vmatpush3.bf16.msra.mxu0 %v204_v3  ;;  %v19_v13 = vld [vmem:[%s327_s0 + $0x8] sm:$0xff]  ;;  %s257_s0 = smov 16   ;;  %v177_v32 = vld [vmem:[%s329_s2] ss:$0 sm:$0xff] }
   0x6   :  { %210 = vmatprep.subr.msk.bf16.mxu0 %vm209_vm3, %v208_v6  ;;  %v121_v11 = vmul.f32 1.442695, %v119_v9  ;;  %v123_v12 = vmul.f32 1.442695, %v120_v10  ;;  %vm147_vm4 = vcmask 130048   ;;  %s258_s5 = smov [#allocation2]  }
   0x7   :  { %s166_s6 = sshll.u32 %s258_s5, 4  ;;  %vm158_vm5 = vcmask 158720   ;;  %s167_s6 = int_to_ptr.vmem [resolvable:$true] %s166_s6 }
   0x8   :  { %224 = vpow2.f32 %v121_v11  ;;  %s232_s7 = scalar_lea.vmem %s167_s6, 128  ;;  %p237_p1 = scmp.lt.s32.totalorder %s167_s6, %s167_s6 }
   0x9   :  { %213 = vmatpush3.bf16.msk.msra.mxu0 %vm209_vm3, %v208_v6  ;;  %226 = vpow2.f32 %v123_v12  ;;  %p233_p0 = scmp.ne.s32.totalorder %s167_s6, %s232_s7  ;;  %p238_p2 = scmp.lt.s32.totalorder %s232_s7, %s232_s7 }
   0xb   :  { %p239_p3 = por %p238_p2, %p237_p1 }
   0xc   :  { %202 = vmatmul.mubr.msk.f32.vlgmr.msra.gmra.mrb[0].mxu0 %vm31_vm1, %v19_v13 }
   0xd   :  { %p240_p4 = pnand %p239_p3, %p233_p0 }
  0x12   :  { %v225_v14 = vpop.eup %224 }
  0x13   :  { %v227_v15 = vpop.eup %226  ;;  %v125_v16 = vadd.f32 1.0, %v225_v14 }
  0x14   :  { %v126_v17 = vadd.f32 1.0, %v227_v15 }
  0x15   :  { %v127_v18 = vmul.f32 %v125_v16, %v125_v16 }
  0x16   :  { %v128_v19 = vmul.f32 %v126_v17, %v126_v17 }
  0x17   :  { %v133_v20 = vadd.f32 1.0, %v127_v18  ;;  %v181_v22 = vadd.f32 -1.0, %v127_v18 }
  0x18   :  { %v134_v21 = vadd.f32 1.0, %v128_v19  ;;  %v182_v23 = vadd.f32 -1.0, %v128_v19 }
  0x19   :  { %228 = vrcp.f32 %v133_v20  ;;  %v131_v24 = vmul.f32 %v181_v22, %v117_v7 }
  0x1a   :  { %230 = vrcp.f32 %v134_v21  ;;  %v132_v25 = vmul.f32 %v182_v23, %v118_v8 }
  0x23   :  { %v229_v26 = vpop.eup %228 }
  0x24   :  { %v231_v27 = vpop.eup %230  ;;  %v137_v28 = vmul.f32 %v229_v26, %v131_v24 }
  0x25   :  { %v138_v29 = vmul.f32 %v231_v27, %v132_v25 }
  0x27   :  { %v219_v30 = vpack.i.bf16 %v138_v29, %v137_v28 }
  0x29   :  { %220 = vrot.lane.b32.xlu0 %v219_v30, %s257_s0 }
  0x9b   :  { %v221_v31 = vpop.permute.xlu0 %220 }
  0x9c   :  { %v223_v33 = vunpack.i.h.bf16 %v221_v31  ;;  %v222_v34 = vunpack.i.l.bf16 %v221_v31 }
  0xdf   :  { %v203_v35 = vpop.f32.mrb[0].mxu0 }
  0xe0   :  { %v114_v36 = vadd.f32 %v203_v35, %v177_v32  ;;  %v108_v37 = vpop.f32.mrb[1].mxu0 }
  0xe1   :  { %v109_v38 = vadd.f32 %v177_v32, %v108_v37 }
  0xe2   :  { %v149_v39 = vsel %vm147_vm4, %v114_v36, %v223_v33 }
  0xe3   :  { %v186_v40 = vpack.c.bf16 %v149_v39, %v149_v39  ;;  %v148_v41 = vsel %vm147_vm4, %v109_v38, %v222_v34 }
  0xe4   :  { %v185_v42 = vpack.c.bf16 %v148_v41, %v148_v41 }
  0xe5   :  { %160 = vst.msk [vmem:[#allocation2 + $0x4] sm:$0xf] %vm158_vm5, %v186_v40 }
  0xe6   :  { %159 = vst.msk [vmem:[#allocation2] sm:$0xf] %vm158_vm5, %v185_v42 }
  0xe7   :  { %243 = shalt.err (!%p240_p4)
}
  0xe8   :  { %s244_s9 = scalar_lea.hbm %s331_s4, 128 }
  0xe9   :  { %p245_p5 = scmp.ne.s32.totalorder %s331_s4, %s244_s9  ;;  %p248_p6 = scmp.lt.u32.totalorder %s244_s9, %s331_s4 }
  0xeb   :  { %p250_p7 = pnand %p248_p6, %p245_p5 }
  0xed   :  { %253 = shalt.err (!%p250_p7)
}
  0xee   :  { %s259_s14 = smov 64   ;;  %s260_s15 = smov 4  }
  0xef   :  { %172 = dma.vmem_to_hbm [thread:$0]  %s167_s6, 128, %s331_s4, [#allocation3], %s259_s14, %s259_s14, %s260_s15  }
  0xf0   :  { %254 = dma.done.wait [#allocation3], 128  }
  0xf1   :  { %255 = vsyncadd [#allocation3], 4294967168 }
  0xf2   :  { %176 = vsyncpa [#allocation3], 1 }

</bundles_post_ra>
